<compile_context>
chip_gen: v5e
topology: v5e:2x2
jax: 0.10.0
libtpu: 0.0.40
codegen_flags: <defaults>
</compile_context>

<pallas_src>
import functools

import jax
import jax.numpy as jnp
from jax import lax
from jax.experimental import pallas as pl
from jax.experimental.pallas import tpu as pltpu

LANES = 128                # lane width of one vreg
MAX_BLOCK_BYTES = 1 << 20  # per input block (x2 for double buffering) -> safe on v5e/v6e/v7x
MAX_SLICES = 256           # cap on statically-unrolled 128-lane slices per tile


def _minmax_kernel(x_ref, omin_ref, omax_ref, *, tile_f, valid_in_last):
    """Streaming running min/max over the lane (column) axis.

    x_ref              : (RB, tile_f)  tile of the folded input
    omin_ref/omax_ref  : (RB, LANES)   lane-wide accumulators, resident across
                                       the reduction grid axis (axis 1)
    tile_f             : static lane-tile width (multiple of LANES)
    valid_in_last      : static number of valid columns in the last tile
    """
    j = pl.program_id(1)
    last = pl.num_programs(1) - 1
    n_slices = tile_f // LANES

    # Initialize the resident accumulators at the start of each row block's
    # reduction; the running state is merged afterwards in the wrapper.
    @pl.when(j == 0)
    def _():
        omin_ref[...] = jnp.full_like(omin_ref, jnp.inf)
        omax_ref[...] = jnp.full_like(omax_ref, -jnp.inf)

    # Hot path: interior tiles are fully in-bounds -> mask-free, pure VPU
    # elementwise fold of 128-lane slices onto the lane-wide accumulators
    # (no XLU reduce, no narrow masked stores in the steady state).
    @pl.when(j < last)
    def _():
        mn = omin_ref[...]
        mx = omax_ref[...]
        for k in range(n_slices):
            sl = x_ref[:, k * LANES:(k + 1) * LANES].astype(jnp.float32)
            mn = jnp.minimum(mn, sl)
            mx = jnp.maximum(mx, sl)
        omin_ref[...] = mn
        omax_ref[...] = mx

    # Last tile: the block may run past the end of the array (OOB block
    # contents are unspecified), so statically skip fully-invalid slices and
    # mask the (at most one) ragged slice.
    @pl.when(j == last)
    def _():
        mn = omin_ref[...]
        mx = omax_ref[...]
        for k in range(n_slices):
            lo = k * LANES
            if lo >= valid_in_last:
                break
            sl = x_ref[:, lo:lo + LANES].astype(jnp.float32)
            if lo + LANES <= valid_in_last:
                mn = jnp.minimum(mn, sl)
                mx = jnp.maximum(mx, sl)
            else:
                col = lax.broadcasted_iota(jnp.int32, sl.shape, 1)
                valid = col < (valid_in_last - lo)
                mn = jnp.minimum(mn, jnp.where(valid, sl, jnp.inf))
                mx = jnp.maximum(mx, jnp.where(valid, sl, -jnp.inf))
        omin_ref[...] = mn
        omax_ref[...] = mx


def _fold_factor(C, F):
    """Rows-per-channel fold factor G: fill >= 16 sublane rows when the channel
    count is small (uses all 8 sublanes of every vreg and gives the v7x
    megacore a 'parallel' row axis worth splitting).  G must divide F so the
    fold is a free, copy-less reshape (no extra HBM traffic)."""
    if C >= 16 or F <= 1:
        return 1
    desired = -(-16 // C)  # ceil(16 / C)
    for g in range(min(desired, F), 0, -1):
        if F % g == 0:
            return g
    return 1


def _minmax_pallas(x2d, cur_min, cur_max):
    """x2d: (C, F); cur_min/cur_max: (C,) running estimates.
    Returns updated (xmin, xmax), each (C,), float32."""
    C, F = x2d.shape

    G = _fold_factor(C, F)
    Crows, Fcols = C * G, F // G
    xr = x2d.reshape(Crows, Fcols)  # contiguous reshape: no HBM copy

    # Row block: 8 sublane rows per block when possible, else the full row dim.
    RB = 8 if Crows % 8 == 0 else Crows
    r_blocks = Crows // RB

    # Lane tile: as large as the per-block VMEM / unroll budget allows.
    itemsize = x2d.dtype.itemsize
    max_tile = (MAX_BLOCK_BYTES // (RB * itemsize)) // LANES * LANES
    max_tile = max(LANES, min(MAX_SLICES * LANES, max_tile))
    tile_f = min(max_tile, pl.cdiv(Fcols, LANES) * LANES)
    grid_j = pl.cdiv(Fcols, tile_f)
    valid_in_last = Fcols - (grid_j - 1) * tile_f

    kernel = functools.partial(_minmax_kernel, tile_f=tile_f,
                               valid_in_last=valid_in_last)

    out_min, out_max = pl.pallas_call(
        kernel,
        out_shape=(
            jax.ShapeDtypeStruct((Crows, LANES), jnp.float32),
            jax.ShapeDtypeStruct((Crows, LANES), jnp.float32),
        ),
        grid_spec=pltpu.PrefetchScalarGridSpec(
            num_scalar_prefetch=0,
            grid=(r_blocks, grid_j),
            in_specs=[
                pl.BlockSpec((RB, tile_f), lambda r, j: (r, j)),
            ],
            out_specs=[
                pl.BlockSpec((RB, LANES), lambda r, j: (r, 0)),
                pl.BlockSpec((RB, LANES), lambda r, j: (r, 0)),
            ],
        ),
        compiler_params=pltpu.CompilerParams(
            # Row blocks are independent (megacore-splittable on v7x);
            # the lane-tile axis is the running reduction.
            dimension_semantics=("parallel", "arbitrary"),
        ),
    )(xr)

    # Fold the lane-wide per-row partials back to one scalar per channel and
    # merge with the running state -- O(C * G * 128) work, done once in XLA.
    xmin = jnp.min(out_min.reshape(C, G * LANES), axis=1)
    xmax = jnp.max(out_max.reshape(C, G * LANES), axis=1)
    xmin = jnp.minimum(xmin, cur_min.astype(jnp.float32))
    xmax = jnp.maximum(xmax, cur_max.astype(jnp.float32))
    return xmin, xmax


class RangeEstimator:
    """JAX/Pallas port of RangeEstimatorBase (current-min-max estimator)."""

    def __init__(self, per_channel=False, quantizer=None):
        self.per_channel = per_channel
        self.quantizer = quantizer
        self.current_xmin = None   # lazily initialized, mirrors UninitializedBuffer
        self.current_xmax = None

    def initialize_parameters(self, data):
        num_channels = data.shape[0] if self.per_channel else 1
        self.current_xmin = jnp.full((num_channels,), jnp.inf, dtype=jnp.float32)
        self.current_xmax = jnp.full((num_channels,), -jnp.inf, dtype=jnp.float32)

    def forward(self, x):
        if self.current_xmin is None:
            self.initialize_parameters(x)

        if self.per_channel:
            C = x.shape[0]
            x2d = x.reshape(C, -1)
        else:
            x2d = x.reshape(1, -1)

        xmin, xmax = _minmax_pallas(x2d, self.current_xmin, self.current_xmax)
        self.current_xmin = xmin
        self.current_xmax = xmax
        return self.current_xmin, self.current_xmax

    def reset(self):
        # TODO(synk): PyTorch lazy-module hook re-registration has no JAX
        # equivalent; resetting the buffers reproduces the observable behaviour.
        self.current_xmin = None
        self.current_xmax = None

    def __call__(self, x):
        return self.forward(x)


if __name__ == "__main__":
    key = jax.random.PRNGKey(0)
    x = jax.random.normal(key, (2, 4, 16, 16), dtype=jnp.float32)  # NCHW

    # per-channel estimator (channel axis = dim 0, as in the PyTorch module)
    est_pc = RangeEstimator(per_channel=True)
    xmin_pc, xmax_pc = est_pc(x)
    jax.block_until_ready((xmin_pc, xmax_pc))

    # per-tensor estimator
    est_pt = RangeEstimator(per_channel=False)
    xmin_pt, xmax_pt = est_pt(x)
    jax.block_until_ready((xmin_pt, xmax_pt))

    # sanity check against plain-JAX reference
    ref_min_pc = jnp.min(x.reshape(2, -1), axis=1)
    ref_max_pc = jnp.max(x.reshape(2, -1), axis=1)
    assert jnp.allclose(xmin_pc, ref_min_pc), (xmin_pc, ref_min_pc)
    assert jnp.allclose(xmax_pc, ref_max_pc), (xmax_pc, ref_max_pc)
    assert jnp.allclose(xmin_pt, jnp.min(x).reshape(1))
    assert jnp.allclose(xmax_pt, jnp.max(x).reshape(1))

    # ragged shape (F not a multiple of the lane tile / fold factor)
    xr = jax.random.normal(jax.random.PRNGKey(2), (3, 5, 7), dtype=jnp.float32)
    est_r = RangeEstimator(per_channel=True)
    rmin, rmax = est_r(xr)
    jax.block_until_ready((rmin, rmax))
    assert jnp.allclose(rmin, jnp.min(xr.reshape(3, -1), axis=1))
    assert jnp.allclose(rmax, jnp.max(xr.reshape(3, -1), axis=1))

    # running update: a second forward call must only shrink xmin / grow xmax
    x2 = jax.random.normal(jax.random.PRNGKey(1), (2, 4, 16, 16), dtype=jnp.float32)
    xmin2, xmax2 = est_pc(x2)
    jax.block_until_ready((xmin2, xmax2))
    assert jnp.all(xmin2 <= xmin_pc) and jnp.all(xmax2 >= xmax_pc)
    ref2_min = jnp.minimum(xmin_pc, jnp.min(x2.reshape(2, -1), axis=1))
    ref2_max = jnp.maximum(xmax_pc, jnp.max(x2.reshape(2, -1), axis=1))
    assert jnp.allclose(xmin2, ref2_min) and jnp.allclose(xmax2, ref2_max)

    print("KERNEL_OK")
</pallas_src>

<mosaic_0001>
module attributes {stable_mosaic.version = 11 : i64} {
  func.func @_minmax_kernel(%arg0: i32, %arg1: i32, %arg2: memref<8x128xf32, #tpu.memory_space<vmem>>, %arg3: memref<8x128xf32, #tpu.memory_space<vmem>>, %arg4: memref<8x128xf32, #tpu.memory_space<vmem>>) attributes {dimension_semantics = [#tpu.dimension_semantics<parallel>, #tpu.dimension_semantics<arbitrary>], iteration_bounds = array<i64: 2, 1>, scalar_prefetch = 0 : i64, scratch_operands = 0 : i64, tpu.core_type = #tpu.core_type<tc>, window_params = [{transform_indices = @transform_0, window_bounds = array<i64: 8, 128>}, {transform_indices = @transform_1, window_bounds = array<i64: 8, 128>}, {transform_indices = @transform_2, window_bounds = array<i64: 8, 128>}]} {
    %c0_i32 = arith.constant 0 : i32
    %0 = arith.cmpi eq, %arg1, %c0_i32 : i32
    %1 = arith.extui %0 : i1 to i32
    %c0_i32_0 = arith.constant 0 : i32
    %2 = arith.cmpi ne, %1, %c0_i32_0 : i32
    scf.if %2 {
      %cst = arith.constant 0x7F800000 : f32
      %9 = vector.broadcast %cst : f32 to vector<8x128xf32>
      %c0 = arith.constant 0 : index
      %c0_5 = arith.constant 0 : index
      %10 = vector.load %arg3[%c0, %c0_5] : memref<8x128xf32, #tpu.memory_space<vmem>>, vector<8x128xf32>
      tpu.vector_store %arg3[%c0, %c0_5], %9 {strides = array<i32>} : memref<8x128xf32, #tpu.memory_space<vmem>>, vector<8x128xf32>,
      %cst_6 = arith.constant 0xFF800000 : f32
      %11 = vector.broadcast %cst_6 : f32 to vector<8x128xf32>
      %c0_7 = arith.constant 0 : index
      %c0_8 = arith.constant 0 : index
      %12 = vector.load %arg4[%c0_7, %c0_8] : memref<8x128xf32, #tpu.memory_space<vmem>>, vector<8x128xf32>
      tpu.vector_store %arg4[%c0_7, %c0_8], %11 {strides = array<i32>} : memref<8x128xf32, #tpu.memory_space<vmem>>, vector<8x128xf32>,
    } else {
    }
    %c0_i32_1 = arith.constant 0 : i32
    %3 = arith.cmpi slt, %arg1, %c0_i32_1 : i32
    %4 = arith.extui %3 : i1 to i32
    %c0_i32_2 = arith.constant 0 : i32
    %5 = arith.cmpi ne, %4, %c0_i32_2 : i32
    scf.if %5 {
      %c0 = arith.constant 0 : index
      %c0_5 = arith.constant 0 : index
      %9 = vector.load %arg3[%c0, %c0_5] : memref<8x128xf32, #tpu.memory_space<vmem>>, vector<8x128xf32>
      %c0_6 = arith.constant 0 : index
      %c0_7 = arith.constant 0 : index
      %10 = vector.load %arg4[%c0_6, %c0_7] : memref<8x128xf32, #tpu.memory_space<vmem>>, vector<8x128xf32>
      %c0_8 = arith.constant 0 : index
      %c0_9 = arith.constant 0 : index
      %11 = vector.load %arg2[%c0_8, %c0_9] : memref<8x128xf32, #tpu.memory_space<vmem>>, vector<8x128xf32>
      %12 = arith.minimumf %9, %11 : vector<8x128xf32>
      %13 = arith.maximumf %10, %11 : vector<8x128xf32>
      %c0_10 = arith.constant 0 : index
      %c0_11 = arith.constant 0 : index
      %14 = vector.load %arg3[%c0_10, %c0_11] : memref<8x128xf32, #tpu.memory_space<vmem>>, vector<8x128xf32>
      tpu.vector_store %arg3[%c0_10, %c0_11], %12 {strides = array<i32>} : memref<8x128xf32, #tpu.memory_space<vmem>>, vector<8x128xf32>,
      %c0_12 = arith.constant 0 : index
      %c0_13 = arith.constant 0 : index
      %15 = vector.load %arg4[%c0_12, %c0_13] : memref<8x128xf32, #tpu.memory_space<vmem>>, vector<8x128xf32>
      tpu.vector_store %arg4[%c0_12, %c0_13], %13 {strides = array<i32>} : memref<8x128xf32, #tpu.memory_space<vmem>>, vector<8x128xf32>,
    } else {
    }
    %c0_i32_3 = arith.constant 0 : i32
    %6 = arith.cmpi eq, %arg1, %c0_i32_3 : i32
    %7 = arith.extui %6 : i1 to i32
    %c0_i32_4 = arith.constant 0 : i32
    %8 = arith.cmpi ne, %7, %c0_i32_4 : i32
    scf.if %8 {
      %c0 = arith.constant 0 : index
      %c0_5 = arith.constant 0 : index
      %9 = vector.load %arg3[%c0, %c0_5] : memref<8x128xf32, #tpu.memory_space<vmem>>, vector<8x128xf32>
      %c0_6 = arith.constant 0 : index
      %c0_7 = arith.constant 0 : index
      %10 = vector.load %arg4[%c0_6, %c0_7] : memref<8x128xf32, #tpu.memory_space<vmem>>, vector<8x128xf32>
      %c0_8 = arith.constant 0 : index
      %c0_9 = arith.constant 0 : index
      %11 = vector.load %arg2[%c0_8, %c0_9] : memref<8x128xf32, #tpu.memory_space<vmem>>, vector<8x128xf32>
      %12 = arith.minimumf %9, %11 : vector<8x128xf32>
      %13 = arith.maximumf %10, %11 : vector<8x128xf32>
      %c0_10 = arith.constant 0 : index
      %c0_11 = arith.constant 0 : index
      %14 = vector.load %arg3[%c0_10, %c0_11] : memref<8x128xf32, #tpu.memory_space<vmem>>, vector<8x128xf32>
      tpu.vector_store %arg3[%c0_10, %c0_11], %12 {strides = array<i32>} : memref<8x128xf32, #tpu.memory_space<vmem>>, vector<8x128xf32>,
      %c0_12 = arith.constant 0 : index
      %c0_13 = arith.constant 0 : index
      %15 = vector.load %arg4[%c0_12, %c0_13] : memref<8x128xf32, #tpu.memory_space<vmem>>, vector<8x128xf32>
      tpu.vector_store %arg4[%c0_12, %c0_13], %13 {strides = array<i32>} : memref<8x128xf32, #tpu.memory_space<vmem>>, vector<8x128xf32>,
    } else {
    }
    return
  }
  func.func @transform_0(%arg0: i32, %arg1: i32) -> (i32, i32) {
    %c0_i32 = arith.constant 0 : i32
    return %arg0, %arg1 : i32, i32
  }
  func.func @transform_1(%arg0: i32, %arg1: i32) -> (i32, i32) {
    %c0_i32 = arith.constant 0 : i32
    %c0_i32_0 = arith.constant 0 : i32
    return %arg0, %c0_i32 : i32, i32
  }
  func.func @transform_2(%arg0: i32, %arg1: i32) -> (i32, i32) {
    %c0_i32 = arith.constant 0 : i32
    %c0_i32_0 = arith.constant 0 : i32
    return %arg0, %c0_i32 : i32, i32
  }
}

</mosaic_0001>

<bundles_post_ra>
// kernel: tpu_custom_call.1
= control target key start
LH: loop header
LB: loop body
LE: loop exit
PB: predicated region body
PF: predicated region fallthrough
CT: control target
= control target key end

     0   :  { %8 = vsyncpa [#allocation3], 0  ;;  %s750_s0 = inlined_call_operand.hbm [shape: f32[16,128], index: 0, kind: input, shape index: {}]   ;;  %s751_s1 = inlined_call_operand.hbm [shape: f32[16,128], index: 1, kind: output, shape index: {0}]   ;;  %s752_s2 = inlined_call_operand.hbm [shape: f32[16,128], index: 2, kind: output, shape index: {1}]  }
   0x1   :  { %10 = vsyncpa [#allocation3 + $0x1], 0 }
   0x2   :  { %11 = vsyncpa [#allocation4], 0 }
   0x3   :  { %13 = vsyncpa [#allocation4 + $0x1], 0 }
   0x4   :  { %14 = vsyncpa [#allocation7], 0 }
   0x5   :  { %16 = vsyncpa [#allocation7 + $0x1], 0  ;;  %s607_s9 = smov 0   ;;  %s609_s10 = smov 0  }
   0x6   :  { %s611_s11 = smov 0   ;;  %s613_s12 = smov 0  }
   0x7   :  { %s615_s13 = smov 0   ;;  %s617_s14 = smov 0  }
   0x8 LB: > { %s361_s15 = sadd.s32 4294967295, %s590_s14   ;;  %s362_s16 = sadd.s32 4294967294, %s590_s14   ;;  %s590_s14 = sphi %s617_s14, %s22_s14   ;;  %s586_s13 = sphi %s615_s13, %s761_s13   ;;  %s582_s12 = sphi %s613_s12, %s760_s12   ;;  %s578_s11 = sphi %s611_s11, %s759_s11   ;;  %s574_s10 = sphi %s609_s10, %s758_s10   ;;  %s570_s9 = sphi %s607_s9, %s757_s9  }
   0x9   : > { %s34_s17 = sadd.s32 1, %s586_s13  ;;  %s43_s18 = sadd.s32 1, %s578_s11 }
   0xa   : > { %p36_p0 = scmp.ge.s32.totalorder %s34_s17, 2  ;;  %p50_p1 = scmp.ne.s32.totalorder %s578_s11, %s574_s10 }
   0xb   : > { %p51_p2 = scmp.eq.s32.totalorder %s590_s14, 0  ;;  %p56_p3 = scmp.ne.s32.totalorder %s574_s10, %s570_s9 }
   0xc   : > { %s763_s17 = smov (%p36_p0, %s34_s17), 0  ;;  %p57_p5 = scmp.eq.s32.totalorder %s361_s15, 0 }
   0xd   : > { %p648_p4 = por %p51_p2, %p50_p1  ;;  %s38_s20 = ssub.s32 %s586_s13, %s763_s17 }
   0xe   : > { %p80_p6 = scmp.eq.s32.totalorder %s361_s15, 1  ;;  %p41_p7 = scmp.eq.s32.totalorder %s38_s20, 0 }
   0xf   : > { %p654_p8 = por %p57_p5, %p56_p3  ;;  %p86_p10 = scmp.eq.s32.totalorder %s362_s16, 1 }
  0x10   : > { %p658_p9 = por %p80_p6, %p50_p1  ;;  %p364_p12 = scmp.ge.s32.totalorder %s590_s14, 2 }
  0x11   : > { %s663_s23 = scalar_select %p41_p7, %s578_s11, %s43_s18  }
  0x12   : > { %p665_p11 = por %p86_p10, %p56_p3  ;;  %p394_p13 = scmp.lt.s32.totalorder %s590_s14, 2 }
  0x13   : > { %s132_s25 = sand.u32 1, %s578_s11   ;;  %s366_s27 = sshll.u32 %s586_s13, 3 }
  0x14   : > { %s365_s26 = sshll.u32 %s132_s25, 3  ;;  %s141_s30 = scalar_lea.hbm %s750_s0, %s366_s27 }
  0x15   : > { %s136_s3 = scalar_lea.vmem [#allocation2], %s365_s26  ;;  %s143_s5 = sshll.u32 %s141_s30, 4  ;;  %s144_s5 = int_to_ptr.hbm [resolvable:$true] %s143_s5 }
  0x16   : > { %s145_s4 = sshll.u32 %s136_s3, 4  ;;  %p384_p0 = pnand %p394_p13, %p648_p4  ;;  %s146_s4 = int_to_ptr.vmem [resolvable:$true] %s145_s4 }
  0x17   : > { %p367_p1 = scmp.ge.s32.totalorder %s590_s14, 1  ;;  %p150_p2 = scmp.lt.s32.totalorder %s590_s14, 3 }
  0x18   : > { %s133_s6 = scalar_lea.sflag [#allocation3], %s132_s25 }
  0x19   : > { %386 = dma.hbm_to_vmem [thread:$0]  (!%p384_p0), %s144_s5, 128, %s146_s4, %s133_s6  }
  0x1a   : > { %p151_p3 = pnand %p367_p1, %p150_p2 }
  0x1b   : > { %s681_s7 = sand.u32 (!%p151_p3), 1, %s574_s10  }
  0x1c   : > { %154 = sbr.rel (%p151_p3) target bundleno = 63 (0x3f), region = 24  ;;  %s368_s8 = sshll.u32 (!%p151_p3), %s681_s7, 3 }
  0x1d   : > { %s157_s15 = scalar_lea.sflag (!%p151_p3), [#allocation3], %s681_s7  ;;  %s160_s16 = scalar_lea.vmem (!%p151_p3), [#allocation2], %s368_s8 }
  0x21   : > { %557 = dma.done.wait (%p654_p8), %s157_s15, 128  }
  0x22   : > { %559 = vsyncadd (%p654_p8), %s157_s15, 4294967168  ;;  %s373_s18 = sshll.u32 %s582_s12, 3  ;;  %s179_s26 = scalar_lea.vmem [#allocation5], %s368_s8  ;;  %v209_v0 = vld [vmem:[%s160_s16] sm:$0xff] }
  0x23   : > { %s230_s25 = scalar_lea.hbm %s751_s1, %s373_s18  ;;  %s232_s27 = sshll.u32 %s179_s26, 4  ;;  %212 = vst [vmem:[%s179_s26] sm:$0xff] %v209_v0  ;;  %s233_s27 = int_to_ptr.vmem [resolvable:$true] %s232_s27 }
  0x24   : > { %s234_s28 = sshll.u32 %s230_s25, 4  ;;  %s244_s3 = scalar_lea.hbm %s752_s2, %s373_s18  ;;  %s235_s28 = int_to_ptr.hbm [resolvable:$true] %s234_s28 }
  0x25   : > { %s186_s4 = scalar_lea.vmem [#allocation6], %s368_s8  ;;  %s248_s21 = sshll.u32 %s244_s3, 4  ;;  %s699_s21 = int_to_ptr.hbm [resolvable:$true] %s248_s21 }
  0x26   : > { %s696_s5 = sshll.u32 %s186_s4, 4  ;;  %213 = vst [vmem:[%s186_s4] sm:$0xff] %v209_v0  ;;  %s215_s12 = scalar_lea.sflag [#allocation4], %s681_s7  ;;  %s247_s5 = int_to_ptr.vmem [resolvable:$true] %s696_s5 }
  0x27   : > { %s490_s6 = sshra.s32 %s235_s28, 4  ;;  %s496_s19 = scalar_lea.hbm %s751_s1, 16  ;;  %s491_s6 = int_to_ptr.hbm [resolvable:$true] %s490_s6 }
  0x28   : > { %s492_s15 = scalar_lea.hbm %s491_s6, 8  ;;  %p497_p7 = scmp.lt.s32.totalorder %s491_s6, %s751_s1 }
  0x29   : > { %p493_p4 = scmp.ne.s32.totalorder %s491_s6, %s492_s15  ;;  %p498_p8 = scmp.lt.s32.totalorder %s496_s19, %s492_s15 }
  0x2b   : > { %p494_p5 = pnand %p493_p4, %p658_p9  ;;  %p499_p10 = por %p498_p8, %p497_p7 }
  0x2d   : > { %p495_p6 = pneg %p494_p5 }
  0x2f   : > { %p500_p13 = pnand %p499_p10, %p495_p6 }
  0x31   : > { %503 = shalt.err (!%p500_p13)
}
  0x32   : > { %379 = dma.vmem_to_hbm [thread:$0]  (%p658_p9), %s233_s27, 128, %s235_s28, %s215_s12  }
  0x33   : > { %s220_s25 = scalar_lea.sflag [#allocation7], %s681_s7  ;;  %s518_s26 = sshra.s32 %s699_s21, 4  ;;  %s519_s26 = int_to_ptr.hbm [resolvable:$true] %s518_s26 }
  0x34   : > { %s520_s29 = scalar_lea.hbm %s519_s26, 8  ;;  %s524_s4 = scalar_lea.hbm %s752_s2, 16 }
  0x35   : > { %p521_p0 = scmp.ne.s32.totalorder %s519_s26, %s520_s29  ;;  %p525_p3 = scmp.lt.s32.totalorder %s519_s26, %s752_s2 }
  0x36   : > { %p526_p4 = scmp.lt.s32.totalorder %s524_s4, %s520_s29 }
  0x37   : > { %p522_p1 = pnand %p521_p0, %p658_p9 }
  0x38   : > { %p527_p5 = por %p526_p4, %p525_p3 }
  0x39   : > { %p523_p2 = pneg %p522_p1 }
  0x3b   : > { %p528_p6 = pnand %p527_p5, %p523_p2 }
  0x3d   : > { %531 = shalt.err (!%p528_p6)
}
  0x3e   : > { %380 = dma.vmem_to_hbm [thread:$0]  (%p658_p9), %s247_s5, 128, %s699_s21, %s220_s25  }
  0x3f PF: > { %s260_s7 = sand.u32 1, %s570_s9   ;;  %p388_p7 = pnand %p364_p12, %p665_p11 }
  0x40   : > { %s261_s27 = scalar_lea.sflag [#allocation4], %s260_s7 }
  0x41   : > { %p389_p8 = pneg %p388_p7 }
  0x43   : > { %561 = dma.done.wait (%p389_p8), %s261_s27, 128  }
  0x44   : > { %563 = vsyncadd (%p389_p8), %s261_s27, 4294967168  ;;  %s271_s28 = scalar_lea.sflag [#allocation7], %s260_s7 }
  0x45   : > { %565 = dma.done.wait (%p389_p8), %s271_s28, 128  }
  0x46   : > { %567 = vsyncadd (%p389_p8), %s271_s28, 4294967168  ;;  %s22_s14 = sadd.s32 1, %s590_s14   ;;  %s757_s9 = smov %s574_s10 }
  0x47   : > { %p19_p10 = scmp.ge.s32.totalorder %s22_s14, 4   ;;  %s758_s10 = smov %s578_s11 }
  0x48   : > { %s759_s11 = smov %s663_s23  ;;  %s760_s12 = smov %s586_s13 }
  0x49   : > { %s761_s13 = smov %s763_s17  ;;  %21 = sbr.rel (!%p19_p10) target bundleno = 8 (0x8), region = 98 }
  0x4e   :  { %277 = vsyncpa [#allocation3], 1 }
  0x4f   :  { %279 = vsyncpa [#allocation3 + $0x1], 1 }
  0x50   :  { %280 = vsyncpa [#allocation4], 1 }
  0x51   :  { %282 = vsyncpa [#allocation4 + $0x1], 1 }
  0x52   :  { %283 = vsyncpa [#allocation7], 1 }
  0x53   :  { %285 = vsyncpa [#allocation7 + $0x1], 1 }

</bundles_post_ra>
